<compile_context>
chip_gen: v6e
topology: v6e:2x2x1
jax: 0.10.0
libtpu: 0.0.40
codegen_flags: <defaults>
</compile_context>

<pallas_src>
import numpy as np
import jax
import jax.numpy as jnp
from jax import lax
from jax.experimental import pallas as pl
from jax.experimental.pallas import tpu as pltpu


def clip_kernel(scale_ref, x_ref, y_ref, o_ref, xn_ref):
    # scale_ref: SMEM scalar-prefetch (1,) f32 = exp(logit_scale)
    # x_ref: (1, TN, D), y_ref: (1, TM, D), o_ref: (1, TN, TM)
    # xn_ref: VMEM scratch (TN, D) holding the scaled+normalized x tile,
    #         reused across the innermost (M-tile) grid axis.
    j = pl.program_id(2)
    eps2 = jnp.float32(1e-24)  # clamp of the *squared* norm == (1e-12)^2

    @pl.when(j == 0)
    def _():
        x = x_ref[0].astype(jnp.float32)                               # (TN, D)
        inv_x = lax.rsqrt(jnp.maximum(jnp.sum(x * x, axis=-1, keepdims=True), eps2))
        # Fold exp(logit_scale) into the per-row inverse norm: replaces an
        # (TN, TM) output-wide multiply with TN per-row scalings.
        xn_ref[...] = (x * (scale_ref[0] * inv_x)).astype(xn_ref.dtype)

    y = y_ref[0].astype(jnp.float32)                                    # (TM, D)
    inv_y = lax.rsqrt(jnp.maximum(jnp.sum(y * y, axis=-1, keepdims=True), eps2))
    yn = (y * inv_y).astype(xn_ref.dtype)

    # (TN, D) x (TM, D) contracting the last dims -> (TN, TM); no explicit
    # transpose of yn, MXU gets the natural operand layout.  f32 accumulate.
    logits = lax.dot_general(
        xn_ref[...], yn,
        dimension_numbers=(((1,), (1,)), ((), ())),
        preferred_element_type=jnp.float32,
    )
    o_ref[0] = logits.astype(o_ref.dtype)


def _pick_tile(dim, preferred, align=128):
    """Largest `align`-aligned divisor of `dim` that is <= `preferred`.

    Falls back to the full dimension (block == whole axis, always legal for
    the (8,128) layout rule) when no aligned divisor exists or dim is small.
    """
    if dim <= preferred:
        return dim
    start = preferred - (preferred % align)
    for t in range(start, 0, -align):
        if dim % t == 0:
            return t
    # TODO(synk): ragged (non-divisible, non-aligned) N/M falls back to a
    # whole-axis block; for very large ragged axes, pad the input instead.
    return dim


def clip_forward(x, y, logit_scale, *, tn=256, tm=512, out_dtype=jnp.float32):
    """x: (B, N, D), y: (B, M, D), logit_scale: scalar parameter.

    Returns exp(logit_scale) * bmm(normalize(x), normalize(y)^T) -> (B, N, M).
    """
    B, N, D = x.shape
    By, M, Dy = y.shape
    assert B == By and D == Dy

    TN = _pick_tile(N, tn)
    TM = _pick_tile(M, tm)

    # MXU operand dtype: keep bf16 inputs in bf16 (f32 accumulation in the
    # dot preserves accuracy); otherwise f32 operands.
    if x.dtype == jnp.bfloat16 and y.dtype == jnp.bfloat16:
        op_dtype = jnp.bfloat16
    else:
        op_dtype = jnp.float32

    # exp() of the learned temperature is cheap scalar glue done outside.
    scale = jnp.exp(logit_scale).reshape((1,)).astype(jnp.float32)

    grid = (B, N // TN, M // TM)

    return pl.pallas_call(
        clip_kernel,
        out_shape=jax.ShapeDtypeStruct((B, N, M), out_dtype),
        grid_spec=pltpu.PrefetchScalarGridSpec(
            num_scalar_prefetch=1,  # exp(logit_scale) lands in SMEM
            grid=grid,
            in_specs=[
                pl.BlockSpec((1, TN, D), lambda b, i, j, s: (b, i, 0)),
                pl.BlockSpec((1, TM, D), lambda b, i, j, s: (b, j, 0)),
            ],
            out_specs=pl.BlockSpec((1, TN, TM), lambda b, i, j, s: (b, i, j)),
            scratch_shapes=[pltpu.VMEM((TN, D), op_dtype)],
        ),
        compiler_params=pltpu.CompilerParams(
            # B and N-tile axes parallel (megacore / v7x 2-TC sharding);
            # M-tile axis arbitrary so the xn scratch reuse is well-ordered.
            dimension_semantics=("parallel", "parallel", "arbitrary"),
            # Explicit scoped-VMEM limit with headroom for v7x's 64 MiB
            # physical VMEM (also raises the 16 MiB v5e default).
            vmem_limit_bytes=48 * 1024 * 1024,
        ),
    )(scale, x, y)


def _reference(x, y, logit_scale):
    xn = x / jnp.maximum(jnp.linalg.norm(x, axis=-1, keepdims=True), 1e-12)
    yn = y / jnp.maximum(jnp.linalg.norm(y, axis=-1, keepdims=True), 1e-12)
    return jnp.exp(logit_scale) * jnp.einsum("bnd,bmd->bnm", xn, yn)


if __name__ == "__main__":
    # Deterministic parameter init, exactly as in Clip.__init__:
    # logit_scale = log(1 / 0.07)
    logit_scale = jnp.asarray(np.log(1.0 / 0.07), dtype=jnp.float32)

    key = jax.random.PRNGKey(0)
    kx, ky, kx2, ky2 = jax.random.split(key, 4)

    # --- Small-shape check (whole-axis blocks) ---
    B, N, M, D = 2, 8, 16, 32
    x = jax.random.normal(kx, (B, N, D), dtype=jnp.float32)
    y = jax.random.normal(ky, (B, M, D), dtype=jnp.float32)

    out = jax.block_until_ready(clip_forward(x, y, logit_scale))
    ref = _reference(x, y, logit_scale)
    assert out.shape == (B, N, M)
    np.testing.assert_allclose(np.asarray(out), np.asarray(ref), rtol=1e-4, atol=1e-4)

    # --- Multi-tile check (exercises N/M tiling + scratch reuse across j) ---
    B2, N2, M2, D2 = 2, 256, 256, 128
    x2 = jax.random.normal(kx2, (B2, N2, D2), dtype=jnp.float32)
    y2 = jax.random.normal(ky2, (B2, M2, D2), dtype=jnp.float32)

    out2 = jax.block_until_ready(clip_forward(x2, y2, logit_scale, tn=128, tm=128))
    ref2 = _reference(x2, y2, logit_scale)
    assert out2.shape == (B2, N2, M2)
    np.testing.assert_allclose(np.asarray(out2), np.asarray(ref2), rtol=1e-4, atol=1e-4)

    print("KERNEL_OK")
</pallas_src>

<mosaic_0001>
module attributes {stable_mosaic.version = 11 : i64} {
  func.func @clip_kernel(%arg0: i32, %arg1: i32, %arg2: i32, %arg3: memref<1xf32, #tpu.memory_space<smem>>, %arg4: memref<1x8x32xf32, #tpu.memory_space<vmem>>, %arg5: memref<1x16x32xf32, #tpu.memory_space<vmem>>, %arg6: memref<1x8x16xf32, #tpu.memory_space<vmem>>, %arg7: memref<8x32xf32, #tpu.memory_space<vmem>>) attributes {dimension_semantics = [#tpu.dimension_semantics<parallel>, #tpu.dimension_semantics<parallel>, #tpu.dimension_semantics<arbitrary>], iteration_bounds = array<i64: 2, 1, 1>, scalar_prefetch = 1 : i64, scratch_operands = 1 : i64, tpu.core_type = #tpu.core_type<tc>, window_params = [{transform_indices = @transform_0, window_bounds = array<i64: 1, 8, 32>}, {transform_indices = @transform_1, window_bounds = array<i64: 1, 16, 32>}, {transform_indices = @transform_2, window_bounds = array<i64: 1, 8, 16>}]} {
    %c0_i32 = arith.constant 0 : i32
    %0 = arith.cmpi eq, %arg2, %c0_i32 : i32
    %1 = arith.extui %0 : i1 to i32
    %cst = arith.constant 1.000000e-24 : f32
    %c0_i32_0 = arith.constant 0 : i32
    %2 = arith.cmpi ne, %1, %c0_i32_0 : i32
    scf.if %2 {
      %c0_11 = arith.constant 0 : index
      %c0_12 = arith.constant 0 : index
      %c0_13 = arith.constant 0 : index
      %18 = vector.load %arg4[%c0_11, %c0_12, %c0_13] : memref<1x8x32xf32, #tpu.memory_space<vmem>>, vector<1x8x32xf32>
      %19 = vector.shape_cast %18 : vector<1x8x32xf32> to vector<8x32xf32>
      %20 = arith.mulf %19, %19 : vector<8x32xf32>
      %cst_14 = arith.constant dense<0.000000e+00> : vector<8xf32>
      %21 = vector.multi_reduction <add>, %20, %cst_14 [1] : vector<8x32xf32> to vector<8xf32>
      %22 = vector.shape_cast %21 : vector<8xf32> to vector<8x1xf32>
      %23 = vector.broadcast %cst : f32 to vector<8x1xf32>
      %24 = arith.maximumf %22, %23 : vector<8x1xf32>
      %25 = math.rsqrt %24 : vector<8x1xf32>
      %c0_15 = arith.constant 0 : index
      %26 = memref.load %arg3[%c0_15] : memref<1xf32, #tpu.memory_space<smem>>
      %27 = vector.broadcast %26 : f32 to vector<8x1xf32>
      %28 = arith.mulf %27, %25 : vector<8x1xf32>
      %29 = vector.broadcast %28 : vector<8x1xf32> to vector<8x32xf32>
      %30 = arith.mulf %19, %29 : vector<8x32xf32>
      %c0_16 = arith.constant 0 : index
      %c0_17 = arith.constant 0 : index
      %31 = vector.load %arg7[%c0_16, %c0_17] : memref<8x32xf32, #tpu.memory_space<vmem>>, vector<8x32xf32>
      tpu.vector_store %arg7[%c0_16, %c0_17], %30 {strides = array<i32>} : memref<8x32xf32, #tpu.memory_space<vmem>>, vector<8x32xf32>,
    } else {
    }
    %c0 = arith.constant 0 : index
    %c0_1 = arith.constant 0 : index
    %c0_2 = arith.constant 0 : index
    %3 = vector.load %arg5[%c0, %c0_1, %c0_2] : memref<1x16x32xf32, #tpu.memory_space<vmem>>, vector<1x16x32xf32>
    %4 = vector.shape_cast %3 : vector<1x16x32xf32> to vector<16x32xf32>
    %5 = arith.mulf %4, %4 : vector<16x32xf32>
    %cst_3 = arith.constant dense<0.000000e+00> : vector<16xf32>
    %6 = vector.multi_reduction <add>, %5, %cst_3 [1] : vector<16x32xf32> to vector<16xf32>
    %7 = vector.shape_cast %6 : vector<16xf32> to vector<16x1xf32>
    %cst_4 = arith.constant 1.000000e-24 : f32
    %8 = vector.broadcast %cst_4 : f32 to vector<16x1xf32>
    %9 = arith.maximumf %7, %8 : vector<16x1xf32>
    %10 = math.rsqrt %9 : vector<16x1xf32>
    %11 = vector.broadcast %10 : vector<16x1xf32> to vector<16x32xf32>
    %12 = arith.mulf %4, %11 : vector<16x32xf32>
    %c0_5 = arith.constant 0 : index
    %c0_6 = arith.constant 0 : index
    %13 = vector.load %arg7[%c0_5, %c0_6] : memref<8x32xf32, #tpu.memory_space<vmem>>, vector<8x32xf32>
    %cst_7 = arith.constant dense<0.000000e+00> : vector<8x16xf32>
    %14 = tpu.matmul %13, %12, %cst_7 {dimension_numbers = #tpu.dot_dimension_numbers<[1], [1], [0], [0], [0, 0, 1, 0], [], []>} : vector<8x32xf32>, vector<16x32xf32>, vector<8x16xf32> -> vector<8x16xf32>
    %c0_8 = arith.constant 0 : index
    %c0_9 = arith.constant 0 : index
    %c0_10 = arith.constant 0 : index
    %15 = vector.load %arg6[%c0_8, %c0_9, %c0_10] : memref<1x8x16xf32, #tpu.memory_space<vmem>>, vector<1x8x16xf32>
    %16 = vector.shape_cast %15 : vector<1x8x16xf32> to vector<8x16xf32>
    %17 = vector.shape_cast %14 : vector<8x16xf32> to vector<1x8x16xf32>
    tpu.vector_store %arg6[%c0_8, %c0_9, %c0_10], %17 {strides = array<i32>} : memref<1x8x16xf32, #tpu.memory_space<vmem>>, vector<1x8x16xf32>,
    return
  }
  func.func @transform_0(%arg0: i32, %arg1: i32, %arg2: i32, %arg3: memref<1xf32, #tpu.memory_space<smem>>) -> (i32, i32, i32) {
    %c0_i32 = arith.constant 0 : i32
    %c0_i32_0 = arith.constant 0 : i32
    return %arg0, %arg1, %c0_i32 : i32, i32, i32
  }
  func.func @transform_1(%arg0: i32, %arg1: i32, %arg2: i32, %arg3: memref<1xf32, #tpu.memory_space<smem>>) -> (i32, i32, i32) {
    %c0_i32 = arith.constant 0 : i32
    %c0_i32_0 = arith.constant 0 : i32
    return %arg0, %arg2, %c0_i32 : i32, i32, i32
  }
  func.func @transform_2(%arg0: i32, %arg1: i32, %arg2: i32, %arg3: memref<1xf32, #tpu.memory_space<smem>>) -> (i32, i32, i32) {
    %c0_i32 = arith.constant 0 : i32
    return %arg0, %arg1, %arg2 : i32, i32, i32
  }
}

</mosaic_0001>

<bundles_post_ra>
// kernel: tpu_custom_call.1
= control target key start
LH: loop header
LB: loop body
LE: loop exit
PB: predicated region body
PF: predicated region fallthrough
CT: control target
= control target key end

     0   :  { %s941_s0 = inlined_call_operand.<no memory space> [shape: f32[1], index: 0, kind: input, shape index: {}]   ;;  %s942_s1 = inlined_call_operand.hbm [shape: f32[2,8,32], index: 1, kind: input, shape index: {}]   ;;  %s943_s2 = inlined_call_operand.hbm [shape: f32[2,16,32], index: 2, kind: input, shape index: {}]   ;;  %s944_s3 = inlined_call_operand.hbm [shape: f32[2,8,16], index: 3, kind: output, shape index: {}]  }
   0x1   :  { %8 = sst [smem:[#allocation4]] %s941_s0 }
   0x2   :  { %9 = vsyncpa [#allocation6], 0 }
   0x3   :  { %11 = vsyncpa [#allocation6 + $0x1], 0 }
   0x4   :  { %12 = vsyncpa [#allocation9], 0 }
   0x5   :  { %14 = vsyncpa [#allocation9 + $0x1], 0 }
   0x6   :  { %15 = vsyncpa [#allocation7], 0 }
   0x7   :  { %17 = vsyncpa [#allocation7 + $0x1], 0  ;;  %s754_s14 = smov 0   ;;  %s756_s15 = smov 0  }
   0x8   :  { %s758_s16 = smov 0   ;;  %s760_s17 = smov 0  }
   0x9   :  { %s762_s18 = smov 0   ;;  %s764_s19 = smov 0  }
   0xa LB: > { %s474_s0 = sadd.s32 4294967295, %s722_s19   ;;  %s475_s20 = sadd.s32 4294967294, %s722_s19   ;;  %s722_s19 = sphi %s764_s19, %s23_s19   ;;  %s718_s18 = sphi %s762_s18, %s956_s18   ;;  %s714_s17 = sphi %s760_s17, %s955_s17   ;;  %s710_s16 = sphi %s758_s16, %s954_s16   ;;  %s706_s15 = sphi %s756_s15, %s953_s15   ;;  %s702_s14 = sphi %s754_s14, %s952_s14  }
   0xb   : > { %s42_s21 = sadd.s32 1, %s718_s18  ;;  %s51_s22 = sadd.s32 1, %s710_s16 }
   0xc   : > { %p44_p0 = scmp.ge.s32.totalorder %s42_s21, 2  ;;  %p58_p1 = scmp.ne.s32.totalorder %s710_s16, %s706_s15 }
   0xd   : > { %p59_p2 = scmp.eq.s32.totalorder %s722_s19, 0  ;;  %p64_p3 = scmp.ne.s32.totalorder %s706_s15, %s702_s14 }
   0xe   : > { %s958_s21 = smov (%p44_p0, %s42_s21), 0  ;;  %p65_p5 = scmp.eq.s32.totalorder %s474_s0, 0 }
   0xf   : > { %p795_p4 = por %p59_p2, %p58_p1  ;;  %s46_s24 = ssub.s32 %s718_s18, %s958_s21 }
  0x10   : > { %p120_p6 = scmp.eq.s32.totalorder %s474_s0, 1  ;;  %p49_p7 = scmp.eq.s32.totalorder %s46_s24, 0 }
  0x11   : > { %p801_p8 = por %p65_p5, %p64_p3  ;;  %p126_p10 = scmp.eq.s32.totalorder %s475_s20, 1 }
  0x12   : > { %p805_p9 = por %p120_p6, %p58_p1  ;;  %p522_p13 = scmp.lt.s32.totalorder %s722_s19, 2 }
  0x13   : > { %s810_s27 = scalar_select %p49_p7, %s710_s16, %s51_s22  }
  0x14   : > { %p812_p11 = por %p126_p10, %p64_p3  ;;  %s819_s29 = sand.u32 1, %s710_s16  }
  0x15   : > { %s478_s30 = sshll.u32 %s819_s29, 3  ;;  %s479_s4 = sshll.u32 %s718_s18, 7 }
  0x16   : > { %s156_s7 = scalar_lea.hbm %s942_s1, %s479_s4  ;;  %s150_s8 = scalar_lea.vmem [#allocation5], %s478_s30 }
  0x17   : > { %s158_s9 = sshll.u32 %s150_s8, 4  ;;  %p828_p0 = pnand %p522_p13, %p795_p4  ;;  %s159_s9 = int_to_ptr.vmem [resolvable:$true] %s158_s9 }
  0x18   : > { %p483_p1 = scmp.ge.s32.totalorder %s722_s19, 1  ;;  %p186_p2 = scmp.lt.s32.totalorder %s722_s19, 3 }
  0x19   : > { %s147_s11 = scalar_lea.sflag [#allocation6], %s819_s29  ;;  %p584_p3 = pneg %p828_p0 }
  0x1a   : > { %s595_s12 = scalar_lea.vmem %s159_s9, 128  ;;  %s724_s13 = smov [#allocation5]  }
  0x1b   : > { %p596_p5 = scmp.ne.s32.totalorder %s159_s9, %s595_s12  ;;  %s600_s0 = sshll.u32 %s724_s13, 4  ;;  %s601_s0 = int_to_ptr.vmem [resolvable:$false] %s600_s0 }
  0x1c   : > { %s602_s20 = scalar_lea.vmem %s601_s0, 256  ;;  %p603_p4 = scmp.lt.s32.totalorder %s159_s9, %s601_s0 }
  0x1d   : > { %p598_p6 = pnand %p596_p5, %p584_p3  ;;  %p604_p10 = scmp.lt.s32.totalorder %s602_s20, %s595_s12 }
  0x1f   : > { %p599_p7 = pneg %p598_p6  ;;  %p605_p13 = por %p604_p10, %p603_p4 }
  0x21   : > { %p606_p12 = pnand %p605_p13, %p599_p7 }
  0x23   : > { %609 = shalt.err (!%p606_p12)
}
  0x24   : > { %514 = dma.hbm_to_vmem [thread:$0]  (!%p828_p0), %s156_s7, 128, %s159_s9, %s147_s11  }
  0x25   : > { %p846_p5 = pnand %p483_p1, %p186_p2  ;;  %s480_s23 = sshll.u32 %s819_s29, 4 }
  0x26   : > { %s494_s24 = sshll.u32 %s718_s18, 8  ;;  %s169_s6 = scalar_lea.vmem [#allocation8], %s480_s23 }
  0x27   : > { %s177_s5 = scalar_lea.hbm %s943_s2, %s494_s24  ;;  %s178_s8 = sshll.u32 %s169_s6, 4  ;;  %s179_s8 = int_to_ptr.vmem [resolvable:$true] %s178_s8 }
  0x28   : > { %s166_s12 = scalar_lea.sflag [#allocation9], %s819_s29  ;;  %s623_s13 = scalar_lea.vmem %s179_s8, 256 }
  0x29   : > { %p624_p12 = scmp.ne.s32.totalorder %s179_s8, %s623_s13  ;;  %s725_s7 = smov [#allocation8]  }
  0x2a   : > { %s628_s9 = sshll.u32 %s725_s7, 4  ;;  %s629_s9 = int_to_ptr.vmem [resolvable:$false] %s628_s9 }
  0x2b   : > { %p626_p6 = pnand %p624_p12, %p584_p3  ;;  %s630_s11 = scalar_lea.vmem %s629_s9, 512 }
  0x2c   : > { %p631_p1 = scmp.lt.s32.totalorder %s179_s8, %s629_s9  ;;  %p632_p2 = scmp.lt.s32.totalorder %s630_s11, %s623_s13 }
  0x2d   : > { %p627_p7 = pneg %p626_p6 }
  0x2e   : > { %p633_p4 = por %p632_p2, %p631_p1 }
  0x30   : > { %p634_p10 = pnand %p633_p4, %p627_p7 }
  0x32   : > { %637 = shalt.err (!%p634_p10)
}
  0x33   : > { %s726_s0 = smov 128   ;;  %s727_s20 = smov 8  }
  0x34   : > { %517 = dma.hbm_to_vmem [thread:$0]  (!%p828_p0), %s177_s5, 256, %s179_s8, %s166_s12, %s726_s0, %s726_s0, %s727_s20  }
  0x35   : > { %190 = sbr.rel (%p846_p5) target bundleno = 440 (0x1b8), region = 28  ;;  %s864_s29 = sand.u32 (!%p846_p5), 1, %s706_s15  }
  0x36   : > { %s484_s23 = sshll.u32 (!%p846_p5), %s864_s29, 3  ;;  %s193_s24 = scalar_lea.sflag (!%p846_p5), [#allocation6], %s864_s29 }
  0x37   : > { %s196_s30 = scalar_lea.vmem (!%p846_p5), [#allocation5], %s484_s23 }
  0x3a   : > { %689 = dma.done.wait (%p801_p8), %s193_s24, 128  }
  0x3b   : > { %691 = vsyncadd (%p801_p8), %s193_s24, 4294967168  ;;  %s485_s10 = sshll.u32 %s864_s29, 4  ;;  %s202_s22 = scalar_lea.sflag [#allocation9], %s864_s29 }
  0x3c   : > { %s205_s4 = scalar_lea.vmem [#allocation8], %s485_s10 }
  0x3d   : > { %693 = dma.done.wait (%p801_p8), %s202_s22, 256  }
  0x3e   : > { %695 = vsyncadd (%p801_p8), %s202_s22, 4294967040  ;;  %v236_v0 = vld [vmem:[%s196_s30] sm:$0xff]  ;;  %vm238_vm0 = vcmask 261120   ;;  %v249_v2 = vld [vmem:[%s205_s4] sm:$0xff]  ;;  %v728_v9 = vmov 0.0   ;;  %vm729_vm1 = vmmov 0  }
  0x3f   : > { %v250_v1 = vld [vmem:[%s205_s4 + $0x8] sm:$0xff]  ;;  %v237_v3 = vmul.f32 %v236_v0, %v236_v0  ;;  %v251_v5 = vmul.f32 %v249_v2, %v249_v2  ;;  %498 = vmatprep.subr.mxu0 %v728_v9  ;;  %502 = vmatprep.mubr.msk.f32.mxu0 %vm729_vm1, %v728_v9  ;;  %s244_s25 = sld [smem:[#allocation4]]  ;;  %s491_s5 = sshll.u32 %s714_s17, 7  ;;  %vm346_vm2 = vcmask 130048  }
  0x40   : > { %v252_v4 = vmul.f32 %v250_v1, %v250_v1  ;;  %s230_s6 = scalar_lea.vmem [#allocation10], %s484_s23  ;;  %s893_s7 = scalar_lea.hbm %s944_s3, %s491_s5 }
  0x41   : > { %v239_v6 = vsel %vm238_vm0, %v237_v3, 0.0  ;;  %v254_v7 = vsel %vm238_vm0, %v251_v5, 0.0  ;;  %s364_s8 = sshll.u32 %s230_s6, 4  ;;  %s349_s9 = scalar_lea.sflag [#allocation7], %s864_s29  ;;  %s895_s8 = int_to_ptr.vmem [resolvable:$true] %s364_s8 }
  0x42   : > { %240 = vadd.xlane.f32.xlu0 %v239_v6  ;;  %255 = vadd.xlane.f32.xlu1 %v254_v7  ;;  %v257_v8 = vsel %vm238_vm0, %v252_v4, 0.0  ;;  %s638_s11 = scalar_lea.vmem %s895_s8, 128  ;;  %s730_s17 = smov [#allocation10]  }
  0x43   : > { %p639_p8 = scmp.ne.s32.totalorder %s895_s8, %s638_s11  ;;  %s642_s0 = sshll.u32 %s730_s17, 4  ;;  %s643_s0 = int_to_ptr.vmem [resolvable:$false] %s642_s0 }
  0x44   : > { %s644_s20 = scalar_lea.vmem %s643_s0, 256  ;;  %p645_p13 = scmp.lt.s32.totalorder %s895_s8, %s643_s0 }
  0x45   : > { %v245_v16 = vstv %s244_s25  ;;  %p640_p0 = pnand %p639_p8, %p805_p9  ;;  %p646_p5 = scmp.lt.s32.totalorder %s644_s20, %s638_s11 }
  0x46   : > { %258 = vadd.xlane.f32.xlu0 %v257_v8 }
  0x47   : > { %p641_p3 = pneg %p640_p0  ;;  %p647_p12 = por %p646_p5, %p645_p13 }
  0x49   : > { %p648_p6 = pnand %p647_p12, %p641_p3 }
  0xcb   : > { %v241_v10 = vpop.xlane.xlu0 %240  ;;  %v256_v11 = vpop.xlane.xlu1 %255 }
  0xcc   : > { %v242_v12 = vmax.f32 %v241_v10, 1e-24  ;;  %v260_v13 = vmax.f32 %v256_v11, 1e-24 }
  0xce   : > { %576 = vrsqrt.f32 %v242_v12 }
  0xcf   : > { %v259_v14 = vpop.xlane.xlu0 %258  ;;  %578 = vrsqrt.f32 %v260_v13 }
  0xd0   : > { %v261_v15 = vmax.f32 %v259_v14, 1e-24 }
  0xd2   : > { %580 = vrsqrt.f32 %v261_v15 }
  0xdb   : > { %v577_v17 = vpop.eup %576 }
  0xdc   : > { %v246_v18 = vmul.f32 %v577_v17, %v245_v16  ;;  %v579_v19 = vpop.eup %578 }
  0xdd   : > { %v264_v23 = vmul.f32 %v579_v19, %v249_v2 }
  0xde   : > { %v247_v20 = vmul.f32 %v246_v18, %v236_v0 }
  0xdf   : > { %v581_v21 = vpop.eup %580 }
  0xe0   : > { %248 = vst.msk [vmem:[#allocation2] sm:$0xff] %vm238_vm0, %v247_v20  ;;  %v265_v22 = vmul.f32 %v581_v21, %v250_v1 }
  0xe2   : > { %499 = vmatpush3.xpose.msk.msra.mxu0 %vm238_vm0, %v265_v22 }
  0xe3   : > { %500 = vmatprep.subr.mxu0 %v728_v9 }
  0xe6   : > { %501 = vmatpush3.xpose.msk.msra.mxu0 %vm238_vm0, %v264_v23 }
  0xe7   : > { %v266_v24 = vld [vmem:[#allocation2] sm:$0xff] }
  0xe9   : > { %503 = vmatmul.mubr.msk.f32.vlgmr.msra.gmra.mxu0 %vm238_vm0, %v266_v24 }
 0x1a9   : > { %v342_v25 = vpop.f32.mrf.mxu0 }
 0x1aa   : > { %347 = vst.msk [vmem:[%s230_s6] sm:$0xff] %vm346_vm2, %v342_v25 }
 0x1ab   : > { %v504_v26 = vpop.f32.mrf.mxu0 }
 0x1ac   : > { %651 = shalt.err (!%p648_p6)
}
 0x1ad   : > { %s652_s23 = scalar_lea.hbm %s893_s7, 128  ;;  %s656_s30 = scalar_lea.hbm %s944_s3, 256 }
 0x1ae   : > { %p653_p7 = scmp.ne.s32.totalorder %s893_s7, %s652_s23  ;;  %p657_p4 = scmp.lt.s32.totalorder %s893_s7, %s944_s3 }
 0x1af   : > { %p658_p10 = scmp.lt.s32.totalorder %s656_s30, %s652_s23 }
 0x1b0   : > { %p654_p1 = pnand %p653_p7, %p805_p9 }
 0x1b1   : > { %p659_p8 = por %p658_p10, %p657_p4 }
 0x1b2   : > { %p655_p2 = pneg %p654_p1 }
 0x1b4   : > { %p660_p0 = pnand %p659_p8, %p655_p2 }
 0x1b6   : > { %663 = shalt.err (!%p660_p0)
}
 0x1b7   : > { %509 = dma.vmem_to_hbm [thread:$0]  (%p805_p9), %s895_s8, 128, %s893_s7, %s349_s9  }
 0x1b8 PF: > { %s376_s4 = sand.u32 1, %s702_s14   ;;  %p951_p3 = scmp.ge.s32.totalorder %s722_s19, 2 }
 0x1b9   : > { %s377_s25 = scalar_lea.sflag [#allocation7], %s376_s4 }
 0x1ba   : > { %p519_p13 = pnand %p951_p3, %p812_p11 }
 0x1bc   : > { %p520_p5 = pneg %p519_p13 }
 0x1be   : > { %697 = dma.done.wait (%p520_p5), %s377_s25, 128  }
 0x1bf   : > { %699 = vsyncadd (%p520_p5), %s377_s25, 4294967168  ;;  %s23_s19 = sadd.s32 1, %s722_s19   ;;  %s952_s14 = smov %s706_s15 }
 0x1c0   : > { %p20_p12 = scmp.ge.s32.totalorder %s23_s19, 4   ;;  %s953_s15 = smov %s710_s16 }
 0x1c1   : > { %s954_s16 = smov %s810_s27  ;;  %s955_s17 = smov %s718_s18 }
 0x1c2   : > { %s956_s18 = smov %s958_s21  ;;  %22 = sbr.rel (!%p20_p12) target bundleno = 10 (0xa), region = 90 }
 0x1c7   :  { %382 = vsyncpa [#allocation6], 1 }
 0x1c8   :  { %384 = vsyncpa [#allocation6 + $0x1], 1 }
 0x1c9   :  { %385 = vsyncpa [#allocation9], 1 }
 0x1ca   :  { %387 = vsyncpa [#allocation9 + $0x1], 1 }
 0x1cb   :  { %388 = vsyncpa [#allocation7], 1 }
 0x1cc   :  { %390 = vsyncpa [#allocation7 + $0x1], 1 }

</bundles_post_ra>
